<compile_context>
chip_gen: v7x
topology: tpu7x:2x2x1
jax: 0.10.0
libtpu: 0.0.40
codegen_flags: <defaults>
</compile_context>

<pallas_src>
import jax
import jax.numpy as jnp
from jax.experimental import pallas as pl
from jax.experimental.pallas import tpu as pltpu

IN_DIM = 28 * 28          # 784
HID = 64                  # logical hidden width
HID_PAD = 128             # lane-padded hidden width
OUT = 10                  # logical output width
OUT_PAD = 128             # lane-padded width used for the W3 matmul / bias add


def resnet_mlp_kernel(x_ref, w1_ref, b1_ref, w2_ref, b2_ref, w3_ref, b3_ref,
                      o_ref):
    """Fused forward: relu(xW1+b1) -> relu(.W2+b2) -> (+residual) -> W3+b3.

    x arrives as f32 straight from HBM and is cast to bf16 in-register (no
    extra HBM traffic); matmul inputs are bf16, accumulation / bias / relu /
    residual stay in f32 (v5e-safe). Only the 10 real logit columns are
    stored back.
    """
    x = x_ref[...].astype(jnp.bfloat16)                        # (TM, 784) bf16
    h1 = jnp.dot(x, w1_ref[...],
                 preferred_element_type=jnp.float32) + b1_ref[...]
    h1 = jnp.maximum(h1, 0.0)                                  # (TM, 128) f32

    h2 = jnp.dot(h1.astype(jnp.bfloat16), w2_ref[...],
                 preferred_element_type=jnp.float32) + b2_ref[...]
    h2 = jnp.maximum(h2, 0.0)                                  # (TM, 128) f32

    do = h2 + h1                   # residual; dropout = identity (eval mode)

    logits = jnp.dot(do.astype(jnp.bfloat16), w3_ref[...],
                     preferred_element_type=jnp.float32) + b3_ref[...]
    # Narrow store: only the 10 real logit columns go back to HBM (40 B/row
    # masked store instead of a 512 B/row padded f32 slab + wrapper slice).
    o_ref[...] = logits[:, :OUT]


def init_params(key):
    """PyTorch nn.Linear-style init: U(-1/sqrt(fan_in), 1/sqrt(fan_in)).
    Weights stored as (in_features, out_features), biases as (1, out)."""
    dims = [(IN_DIM, HID), (HID, HID), (HID, OUT)]
    params = []
    keys = jax.random.split(key, 2 * len(dims))
    for i, (fan_in, fan_out) in enumerate(dims):
        bound = 1.0 / (fan_in ** 0.5)
        w = jax.random.uniform(keys[2 * i], (fan_in, fan_out),
                               minval=-bound, maxval=bound, dtype=jnp.float32)
        b = jax.random.uniform(keys[2 * i + 1], (1, fan_out),
                               minval=-bound, maxval=bound, dtype=jnp.float32)
        params += [w, b]
    return tuple(params)


def prepare_params(params):
    """One-time prep: zero-pad hidden/output widths to 128 lanes and cast the
    weights to bf16 (MXU input dtype). Mathematically inert: padded biases are
    0, relu(0)=0, residual of zeros is zero, and the kernel only stores the
    first 10 logit columns."""
    w1, b1, w2, b2, w3, b3 = params
    w1p = jnp.zeros((IN_DIM, HID_PAD), jnp.float32).at[:, :HID].set(w1)
    b1p = jnp.zeros((1, HID_PAD), jnp.float32).at[:, :HID].set(b1)
    w2p = jnp.zeros((HID_PAD, HID_PAD), jnp.float32).at[:HID, :HID].set(w2)
    b2p = jnp.zeros((1, HID_PAD), jnp.float32).at[:, :HID].set(b2)
    w3p = jnp.zeros((HID_PAD, OUT_PAD), jnp.float32).at[:HID, :OUT].set(w3)
    b3p = jnp.zeros((1, OUT_PAD), jnp.float32).at[:, :OUT].set(b3)
    return (w1p.astype(jnp.bfloat16), b1p,
            w2p.astype(jnp.bfloat16), b2p,
            w3p.astype(jnp.bfloat16), b3p)


def resnet_forward(x, prepared_params, tm=2048):
    """Batch-tiled fused forward. Weights pinned in VMEM across grid steps
    (constant index_map), x/out tiles double-buffered by the Pallas pipeline.
    Ragged batches use an uneven last tile (no jnp.pad copy)."""
    w1, b1, w2, b2, w3, b3 = prepared_params
    B, d_in = x.shape

    # Clamp the tile: multiple of 8, and aim for >= 2 grid steps so the
    # "parallel" batch axis can feed both v7x TensorCores.
    tm = min(tm, max(8, pl.cdiv(pl.cdiv(B, 2), 8) * 8))
    tm = max(8, (tm // 8) * 8)
    grid = (pl.cdiv(B, tm),)   # last tile may be partial; OOB rows are dropped

    flops = 2 * B * (IN_DIM * HID + HID * HID + HID * OUT)
    bytes_accessed = (
        x.size * 4                                   # f32 x read
        + (w1.size + w2.size + w3.size) * 2          # bf16 weights (resident)
        + (b1.size + b2.size + b3.size) * 4          # f32 biases
        + B * OUT * 4                                # narrow f32 logits
    )

    out = pl.pallas_call(
        resnet_mlp_kernel,
        out_shape=jax.ShapeDtypeStruct((B, OUT), jnp.float32),
        grid=grid,
        in_specs=[
            pl.BlockSpec((tm, d_in), lambda i: (i, 0)),          # x tile (f32)
            pl.BlockSpec((IN_DIM, HID_PAD), lambda i: (0, 0)),   # W1 (resident)
            pl.BlockSpec((1, HID_PAD), lambda i: (0, 0)),        # b1
            pl.BlockSpec((HID_PAD, HID_PAD), lambda i: (0, 0)),  # W2
            pl.BlockSpec((1, HID_PAD), lambda i: (0, 0)),        # b2
            pl.BlockSpec((HID_PAD, OUT_PAD), lambda i: (0, 0)),  # W3
            pl.BlockSpec((1, OUT_PAD), lambda i: (0, 0)),        # b3
        ],
        out_specs=pl.BlockSpec((tm, OUT), lambda i: (i, 0)),     # narrow logits
        compiler_params=pltpu.CompilerParams(
            dimension_semantics=("parallel",),
            vmem_limit_bytes=32 * 1024 * 1024,   # v7x-safe (64 MiB physical)
        ),
        cost_estimate=pl.CostEstimate(
            flops=flops, transcendentals=0, bytes_accessed=bytes_accessed),
    )(x, w1, b1, w2, b2, w3, b3)

    return out


def reference_forward(x, params):
    """Plain-JAX reference mimicking the kernel's numerics (bf16 matmul
    inputs, f32 accumulation / elementwise)."""
    w1, b1, w2, b2, w3, b3 = params
    rt = lambda a: a.astype(jnp.bfloat16).astype(jnp.float32)
    hp = jax.lax.Precision.HIGHEST
    h1 = jnp.maximum(jnp.dot(rt(x), rt(w1), precision=hp) + b1, 0.0)
    h2 = jnp.maximum(jnp.dot(rt(h1), rt(w2), precision=hp) + b2, 0.0)
    do = h2 + h1
    return jnp.dot(rt(do), rt(w3), precision=hp) + b3


if __name__ == "__main__":
    key = jax.random.PRNGKey(0)
    k_param, k_x1, k_x2 = jax.random.split(key, 3)

    params = init_params(k_param)
    prepared = prepare_params(params)

    # Small single-tile case.
    batch = 8
    x = jax.random.normal(k_x1, (batch, IN_DIM), dtype=jnp.float32)
    logits = jax.block_until_ready(resnet_forward(x, prepared))
    ref = reference_forward(x, params)
    assert logits.shape == (batch, OUT)
    assert jnp.allclose(logits, ref, atol=2e-3, rtol=2e-3)

    # Multi-tile case with a non-multiple batch (exercises the grid and the
    # uneven / partially-out-of-bounds last tile, no padding copy).
    batch2 = 300
    x2 = jax.random.normal(k_x2, (batch2, IN_DIM), dtype=jnp.float32)
    logits2 = jax.block_until_ready(resnet_forward(x2, prepared, tm=128))
    ref2 = reference_forward(x2, params)
    assert logits2.shape == (batch2, OUT)
    assert jnp.allclose(logits2, ref2, atol=2e-3, rtol=2e-3)

    print("KERNEL_OK")
</pallas_src>

<mosaic_0001>
module attributes {stable_mosaic.version = 11 : i64} {
  func.func @resnet_mlp_kernel(%arg0: i32, %arg1: memref<8x784xf32, #tpu.memory_space<vmem>>, %arg2: memref<784x128xbf16, #tpu.memory_space<vmem>>, %arg3: memref<1x128xf32, #tpu.memory_space<vmem>>, %arg4: memref<128x128xbf16, #tpu.memory_space<vmem>>, %arg5: memref<1x128xf32, #tpu.memory_space<vmem>>, %arg6: memref<128x128xbf16, #tpu.memory_space<vmem>>, %arg7: memref<1x128xf32, #tpu.memory_space<vmem>>, %arg8: memref<8x10xf32, #tpu.memory_space<vmem>>) attributes {dimension_semantics = [#tpu.dimension_semantics<parallel>], iteration_bounds = array<i64: 1>, scalar_prefetch = 0 : i64, scratch_operands = 0 : i64, tpu.core_type = #tpu.core_type<tc>, window_params = [{transform_indices = @transform_0, window_bounds = array<i64: 8, 784>}, {pipeline_mode = #tpu.pipeline_mode<synchronous>, transform_indices = @transform_1, window_bounds = array<i64: 784, 128>}, {pipeline_mode = #tpu.pipeline_mode<synchronous>, transform_indices = @transform_2, window_bounds = array<i64: 1, 128>}, {pipeline_mode = #tpu.pipeline_mode<synchronous>, transform_indices = @transform_3, window_bounds = array<i64: 128, 128>}, {pipeline_mode = #tpu.pipeline_mode<synchronous>, transform_indices = @transform_4, window_bounds = array<i64: 1, 128>}, {pipeline_mode = #tpu.pipeline_mode<synchronous>, transform_indices = @transform_5, window_bounds = array<i64: 128, 128>}, {pipeline_mode = #tpu.pipeline_mode<synchronous>, transform_indices = @transform_6, window_bounds = array<i64: 1, 128>}, {transform_indices = @transform_7, window_bounds = array<i64: 8, 10>}]} {
    %c0 = arith.constant 0 : index
    %c0_0 = arith.constant 0 : index
    %0 = vector.load %arg1[%c0, %c0_0] : memref<8x784xf32, #tpu.memory_space<vmem>>, vector<8x784xf32>
    %1 = arith.truncf %0 : vector<8x784xf32> to vector<8x784xbf16>
    %c0_1 = arith.constant 0 : index
    %c0_2 = arith.constant 0 : index
    %2 = vector.load %arg2[%c0_1, %c0_2] : memref<784x128xbf16, #tpu.memory_space<vmem>>, vector<784x128xbf16>
    %cst = arith.constant dense<0.000000e+00> : vector<8x128xf32>
    %3 = tpu.matmul %1, %2, %cst {dimension_numbers = #tpu.dot_dimension_numbers<[1], [0], [0], [1], [0, 0, 1, 1], [], []>} : vector<8x784xbf16>, vector<784x128xbf16>, vector<8x128xf32> -> vector<8x128xf32>
    %c0_3 = arith.constant 0 : index
    %c0_4 = arith.constant 0 : index
    %4 = vector.load %arg3[%c0_3, %c0_4] : memref<1x128xf32, #tpu.memory_space<vmem>>, vector<1x128xf32>
    %5 = vector.broadcast %4 : vector<1x128xf32> to vector<8x128xf32>
    %6 = arith.addf %3, %5 : vector<8x128xf32>
    %cst_5 = arith.constant 0.000000e+00 : f32
    %7 = vector.broadcast %cst_5 : f32 to vector<8x128xf32>
    %8 = arith.maximumf %6, %7 : vector<8x128xf32>
    %9 = arith.truncf %8 : vector<8x128xf32> to vector<8x128xbf16>
    %c0_6 = arith.constant 0 : index
    %c0_7 = arith.constant 0 : index
    %10 = vector.load %arg4[%c0_6, %c0_7] : memref<128x128xbf16, #tpu.memory_space<vmem>>, vector<128x128xbf16>
    %cst_8 = arith.constant dense<0.000000e+00> : vector<8x128xf32>
    %11 = tpu.matmul %9, %10, %cst_8 {dimension_numbers = #tpu.dot_dimension_numbers<[1], [0], [0], [1], [0, 0, 1, 1], [], []>} : vector<8x128xbf16>, vector<128x128xbf16>, vector<8x128xf32> -> vector<8x128xf32>
    %c0_9 = arith.constant 0 : index
    %c0_10 = arith.constant 0 : index
    %12 = vector.load %arg5[%c0_9, %c0_10] : memref<1x128xf32, #tpu.memory_space<vmem>>, vector<1x128xf32>
    %13 = vector.broadcast %12 : vector<1x128xf32> to vector<8x128xf32>
    %14 = arith.addf %11, %13 : vector<8x128xf32>
    %cst_11 = arith.constant 0.000000e+00 : f32
    %15 = vector.broadcast %cst_11 : f32 to vector<8x128xf32>
    %16 = arith.maximumf %14, %15 : vector<8x128xf32>
    %17 = arith.addf %16, %8 : vector<8x128xf32>
    %18 = arith.truncf %17 : vector<8x128xf32> to vector<8x128xbf16>
    %c0_12 = arith.constant 0 : index
    %c0_13 = arith.constant 0 : index
    %19 = vector.load %arg6[%c0_12, %c0_13] : memref<128x128xbf16, #tpu.memory_space<vmem>>, vector<128x128xbf16>
    %cst_14 = arith.constant dense<0.000000e+00> : vector<8x128xf32>
    %20 = tpu.matmul %18, %19, %cst_14 {dimension_numbers = #tpu.dot_dimension_numbers<[1], [0], [0], [1], [0, 0, 1, 1], [], []>} : vector<8x128xbf16>, vector<128x128xbf16>, vector<8x128xf32> -> vector<8x128xf32>
    %c0_15 = arith.constant 0 : index
    %c0_16 = arith.constant 0 : index
    %21 = vector.load %arg7[%c0_15, %c0_16] : memref<1x128xf32, #tpu.memory_space<vmem>>, vector<1x128xf32>
    %22 = vector.broadcast %21 : vector<1x128xf32> to vector<8x128xf32>
    %23 = arith.addf %20, %22 : vector<8x128xf32>
    %24 = vector.extract_strided_slice %23 {offsets = [0, 0], sizes = [8, 10], strides = [1, 1]} : vector<8x128xf32> to vector<8x10xf32>
    %c0_17 = arith.constant 0 : index
    %c0_18 = arith.constant 0 : index
    %25 = vector.load %arg8[%c0_17, %c0_18] : memref<8x10xf32, #tpu.memory_space<vmem>>, vector<8x10xf32>
    tpu.vector_store %arg8[%c0_17, %c0_18], %24 {strides = array<i32>} : memref<8x10xf32, #tpu.memory_space<vmem>>, vector<8x10xf32>,
    return
  }
  func.func @transform_0(%arg0: i32) -> (i32, i32) {
    %c0_i32 = arith.constant 0 : i32
    %c0_i32_0 = arith.constant 0 : i32
    return %arg0, %c0_i32 : i32, i32
  }
  func.func @transform_1(%arg0: i32) -> (i32, i32) {
    %c0_i32 = arith.constant 0 : i32
    %c0_i32_0 = arith.constant 0 : i32
    %c0_i32_1 = arith.constant 0 : i32
    return %c0_i32, %c0_i32_0 : i32, i32
  }
  func.func @transform_2(%arg0: i32) -> (i32, i32) {
    %c0_i32 = arith.constant 0 : i32
    %c0_i32_0 = arith.constant 0 : i32
    %c0_i32_1 = arith.constant 0 : i32
    return %c0_i32, %c0_i32_0 : i32, i32
  }
  func.func @transform_3(%arg0: i32) -> (i32, i32) {
    %c0_i32 = arith.constant 0 : i32
    %c0_i32_0 = arith.constant 0 : i32
    %c0_i32_1 = arith.constant 0 : i32
    return %c0_i32, %c0_i32_0 : i32, i32
  }
  func.func @transform_4(%arg0: i32) -> (i32, i32) {
    %c0_i32 = arith.constant 0 : i32
    %c0_i32_0 = arith.constant 0 : i32
    %c0_i32_1 = arith.constant 0 : i32
    return %c0_i32, %c0_i32_0 : i32, i32
  }
  func.func @transform_5(%arg0: i32) -> (i32, i32) {
    %c0_i32 = arith.constant 0 : i32
    %c0_i32_0 = arith.constant 0 : i32
    %c0_i32_1 = arith.constant 0 : i32
    return %c0_i32, %c0_i32_0 : i32, i32
  }
  func.func @transform_6(%arg0: i32) -> (i32, i32) {
    %c0_i32 = arith.constant 0 : i32
    %c0_i32_0 = arith.constant 0 : i32
    %c0_i32_1 = arith.constant 0 : i32
    return %c0_i32, %c0_i32_0 : i32, i32
  }
  func.func @transform_7(%arg0: i32) -> (i32, i32) {
    %c0_i32 = arith.constant 0 : i32
    %c0_i32_0 = arith.constant 0 : i32
    return %arg0, %c0_i32 : i32, i32
  }
}

</mosaic_0001>

<bundles_post_ra>
// kernel: tpu_custom_call.1
= control target key start
LH: loop header
LB: loop body
LE: loop exit
PB: predicated region body
PF: predicated region fallthrough
CT: control target
= control target key end

     0   :  { %12 = vsyncpa [#allocation3], 0  ;;  %s1447_s0 = inlined_call_operand.hbm [shape: f32[8,784], index: 0, kind: input, shape index: {}]   ;;  %s1448_s1 = inlined_call_operand.hbm [shape: bf16[784,128], index: 1, kind: input, shape index: {}]   ;;  %s1449_s2 = inlined_call_operand.vmem [shape: f32[1,128], index: 2, kind: input, shape index: {}]   ;;  %s1450_s3 = inlined_call_operand.hbm [shape: bf16[128,128], index: 3, kind: input, shape index: {}]   ;;  %s1451_s4 = inlined_call_operand.vmem [shape: f32[1,128], index: 4, kind: input, shape index: {}]   ;;  %s1452_s5 = inlined_call_operand.hbm [shape: bf16[128,128], index: 5, kind: input, shape index: {}]   ;;  %s1453_s6 = inlined_call_operand.vmem [shape: f32[1,128], index: 6, kind: input, shape index: {}]   ;;  %s1454_s7 = inlined_call_operand.hbm [shape: f32[8,10], index: 7, kind: output, shape index: {}]  }
   0x1   :  { %13 = vsyncpa [#allocation6], 0 }
   0x2   :  { %14 = vsyncpa [#allocation9], 0 }
   0x3   :  { %15 = vsyncpa [#allocation4], 0  ;;  %s1297_s24 = smov [#allocation5]   ;;  %s1179_s28 = scalar_lea.hbm %s1448_s1, 6272 }
   0x4   :  { %s31_s25 = sshll.u32 %s1297_s24, 4  ;;  %p1180_p0 = scmp.ne.s32.totalorder %s1448_s1, %s1179_s28  ;;  %s32_s25 = int_to_ptr.vmem [resolvable:$true] %s31_s25 }
   0x5   :  { %p1183_p1 = scmp.lt.u32.totalorder %s1179_s28, %s1448_s1 }
   0x7   :  { %p1185_p2 = pnand %p1183_p1, %p1180_p0 }
   0x9   :  { %1188 = shalt.err (!%p1185_p2)
}
   0xa   :  { %s1189_s10 = scalar_lea.vmem %s32_s25, 6272  ;;  %p1194_p4 = scmp.lt.s32.totalorder %s32_s25, %s32_s25 }
   0xb   :  { %p1190_p3 = scmp.ne.s32.totalorder %s32_s25, %s1189_s10  ;;  %p1195_p5 = scmp.lt.s32.totalorder %s1189_s10, %s1189_s10 }
   0xd   :  { %p1196_p6 = por %p1195_p5, %p1194_p4 }
   0xf   :  { %p1197_p7 = pnand %p1196_p6, %p1190_p3 }
  0x11   :  { %1200 = shalt.err (!%p1197_p7)
}
  0x12   :  { %s1298_s11 = smov 64   ;;  %s1299_s12 = smov 4  }
  0x13   :  { %37 = dma.hbm_to_vmem [thread:$0]  %s1448_s1, 6272, %s32_s25, [#allocation6], %s1298_s11, %s1298_s11, %s1299_s12  }
  0x14   :  { %s1300_s15 = smov [#allocation2]   ;;  %s1301_s17 = smov [#allocation7]  }
  0x15   :  { %s22_s16 = sshll.u32 %s1300_s15, 4  ;;  %s45_s18 = sshll.u32 %s1301_s17, 4  ;;  %s23_s16 = int_to_ptr.vmem [resolvable:$true] %s22_s16  ;;  %s46_s18 = int_to_ptr.vmem [resolvable:$true] %s45_s18 }
  0x16   :  { %s1201_s21 = scalar_lea.hbm %s1447_s0, 896 }
  0x17   :  { %p1202_p8 = scmp.ne.s32.totalorder %s1447_s0, %s1201_s21  ;;  %p1205_p9 = scmp.lt.u32.totalorder %s1201_s21, %s1447_s0 }
  0x19   :  { %p1207_p10 = pnand %p1205_p9, %p1202_p8 }
  0x1b   :  { %1210 = shalt.err (!%p1207_p10)
}
  0x1c   :  { %s1211_s1 = scalar_lea.vmem %s23_s16, 896  ;;  %p1216_p12 = scmp.lt.s32.totalorder %s23_s16, %s23_s16 }
  0x1d   :  { %p1212_p11 = scmp.ne.s32.totalorder %s23_s16, %s1211_s1  ;;  %p1217_p13 = scmp.lt.s32.totalorder %s1211_s1, %s1211_s1 }
  0x1f   :  { %p1218_p0 = por %p1217_p13, %p1216_p12 }
  0x21   :  { %p1219_p1 = pnand %p1218_p0, %p1212_p11 }
  0x23   :  { %1222 = shalt.err (!%p1219_p1)
}
  0x24   :  { %25 = dma.hbm_to_vmem [thread:$0]  %s1447_s0, 896, %s23_s16, [#allocation3]  }
  0x25   :  { %s1223_s30 = scalar_lea.hbm %s1450_s3, 1024 }
  0x26   :  { %p1224_p2 = scmp.ne.s32.totalorder %s1450_s3, %s1223_s30  ;;  %p1227_p3 = scmp.lt.u32.totalorder %s1223_s30, %s1450_s3 }
  0x28   :  { %p1229_p4 = pnand %p1227_p3, %p1224_p2 }
  0x2a   :  { %1232 = shalt.err (!%p1229_p4)
}
  0x2b   :  { %s1233_s14 = scalar_lea.vmem %s46_s18, 1024  ;;  %p1238_p6 = scmp.lt.s32.totalorder %s46_s18, %s46_s18 }
  0x2c   :  { %p1234_p5 = scmp.ne.s32.totalorder %s46_s18, %s1233_s14  ;;  %p1239_p7 = scmp.lt.s32.totalorder %s1233_s14, %s1233_s14 }
  0x2e   :  { %p1240_p8 = por %p1239_p7, %p1238_p6 }
  0x30   :  { %p1241_p9 = pnand %p1240_p8, %p1234_p5 }
  0x32   :  { %1244 = shalt.err (!%p1241_p9)
}
  0x33   :  { %51 = dma.hbm_to_vmem [thread:$0]  %s1450_s3, 1024, %s46_s18, [#allocation6], %s1298_s11, %s1298_s11, %s1299_s12  }
  0x34   :  { %s1302_s16 = smov [#allocation8]   ;;  %s1245_s21 = scalar_lea.hbm %s1452_s5, 1024 }
  0x35   :  { %s59_s17 = sshll.u32 %s1302_s16, 4  ;;  %p1246_p10 = scmp.ne.s32.totalorder %s1452_s5, %s1245_s21  ;;  %s60_s17 = int_to_ptr.vmem [resolvable:$true] %s59_s17 }
  0x36   :  { %p1249_p11 = scmp.lt.u32.totalorder %s1245_s21, %s1452_s5 }
  0x38   :  { %p1251_p12 = pnand %p1249_p11, %p1246_p10 }
  0x3a   :  { %1254 = shalt.err (!%p1251_p12)
}
  0x3b   :  { %s1255_s1 = scalar_lea.vmem %s60_s17, 1024  ;;  %p1260_p0 = scmp.lt.s32.totalorder %s60_s17, %s60_s17 }
  0x3c   :  { %p1256_p13 = scmp.ne.s32.totalorder %s60_s17, %s1255_s1  ;;  %p1261_p1 = scmp.lt.s32.totalorder %s1255_s1, %s1255_s1 }
  0x3e   :  { %p1262_p2 = por %p1261_p1, %p1260_p0 }
  0x40   :  { %p1263_p3 = pnand %p1262_p2, %p1256_p13 }
  0x42   :  { %1266 = shalt.err (!%p1263_p3)
}
  0x43   :  { %65 = dma.hbm_to_vmem [thread:$0]  %s1452_s5, 1024, %s60_s17, [#allocation9], %s1298_s11, %s1298_s11, %s1299_s12  }
  0x44   :  { %1289 = dma.done.wait [#allocation3], 896  }
  0x45   :  { %1290 = vsyncadd [#allocation3], 4294966400 }
  0x46   :  { %1291 = dma.done.wait [#allocation6], 7296  }
  0x47   :  { %1292 = vsyncadd [#allocation6], 4294960000 }
  0x48   :  { %1293 = dma.done.wait [#allocation9], 1024  }
  0x49   :  { %1294 = vsyncadd [#allocation9], 4294966272  ;;  %v1114_v0 = vld [vmem:[#allocation5 + $0x40] sm:$0xff]   ;;  %v1118_v4 = vld [vmem:[#allocation5 + $0x48] sm:$0xff]   ;;  %v1303_v44 = vmov 0.0   ;;  %vm1304_vm0 = vmmov 0  }
  0x4a   :  { %v1115_v1 = vld [vmem:[#allocation5] sm:$0xff]   ;;  %973 = vmatprep.subr.bf16.mxu0 %v1114_v0  ;;  %v1119_v5 = vld [vmem:[#allocation5 + $0x8] sm:$0xff]   ;;  %v1122_v8 = vld [vmem:[#allocation5 + $0x50] sm:$0xff]   ;;  %vm494_vm1 = vcmask 130048   ;;  %s1305_s28 = smov [#allocation10]   ;;  %vm885_vm2 = vcmask 80896  }
  0x4b   :  { %v1116_v2 = vld [vmem:[#allocation5 + $0xc0] sm:$0xff]   ;;  %974 = vmatpush3.bf16.msra.mxu0 %v1115_v1  ;;  %v1120_v6 = vld [vmem:[#allocation5 + $0xc8] sm:$0xff]   ;;  %v1123_v9 = vld [vmem:[#allocation5 + $0x10] sm:$0xff]   ;;  %s893_s29 = sshll.u32 %s1305_s28, 4  ;;  %s894_s29 = int_to_ptr.vmem [resolvable:$true] %s893_s29 }
  0x4c   :  { %v1117_v3 = vld [vmem:[#allocation5 + $0x80] sm:$0xff]   ;;  %995 = vmatprep.subr.bf16.mxu1 %v1116_v2  ;;  %975 = vmatprep.subr.bf16.mxu0 %v1118_v4  ;;  %v1121_v7 = vld [vmem:[#allocation5 + $0x88] sm:$0xff]   ;;  %v1124_v10 = vld [vmem:[#allocation5 + $0xd0] sm:$0xff]   ;;  %p1272_p5 = scmp.lt.s32.totalorder %s894_s29, %s894_s29 }
  0x4d   :  { %996 = vmatpush3.bf16.msra.mxu1 %v1117_v3  ;;  %v1125_v11 = vld [vmem:[#allocation5 + $0x90] sm:$0xff]   ;;  %v1126_v12 = vld [vmem:[#allocation5 + $0x58] sm:$0xff]   ;;  %v1130_v16 = vld [vmem:[#allocation5 + $0x60] sm:$0xff]  }
  0x4e   :  { %997 = vmatprep.subr.bf16.mxu1 %v1120_v6  ;;  %v1127_v13 = vld [vmem:[#allocation5 + $0x18] sm:$0xff]   ;;  %v1131_v17 = vld [vmem:[#allocation5 + $0x20] sm:$0xff]   ;;  %v1134_v20 = vld [vmem:[#allocation5 + $0x68] sm:$0xff]  }
  0x4f   :  { %976 = vmatpush3.bf16.msra.mxu0 %v1119_v5  ;;  %v1128_v14 = vld [vmem:[#allocation5 + $0xd8] sm:$0xff]   ;;  %v1132_v18 = vld [vmem:[#allocation5 + $0xe0] sm:$0xff]   ;;  %v1135_v21 = vld [vmem:[#allocation5 + $0x28] sm:$0xff]  }
  0x50   :  { %977 = vmatprep.subr.bf16.mxu0 %v1122_v8  ;;  %v1129_v15 = vld [vmem:[#allocation5 + $0x98] sm:$0xff]   ;;  %v1133_v19 = vld [vmem:[#allocation5 + $0xa0] sm:$0xff]   ;;  %v1136_v22 = vld [vmem:[#allocation5 + $0xe8] sm:$0xff]  }
  0x51   :  { %998 = vmatpush3.bf16.msra.mxu1 %v1121_v7  ;;  %v1137_v23 = vld [vmem:[#allocation5 + $0xa8] sm:$0xff]   ;;  %v1138_v24 = vld [vmem:[#allocation5 + $0x70] sm:$0xff]   ;;  %v1142_v28 = vld [vmem:[#allocation5 + $0x78] sm:$0xff]  }
  0x52   :  { %999 = vmatprep.subr.bf16.mxu1 %v1124_v10  ;;  %v1139_v25 = vld [vmem:[#allocation5 + $0x30] sm:$0xff]   ;;  %v1143_v29 = vld [vmem:[#allocation5 + $0x38] sm:$0xff]   ;;  %v81_v34 = vld [vmem:[#allocation2] sm:$0xff] }
  0x53   :  { %978 = vmatpush3.bf16.msra.mxu0 %v1123_v9  ;;  %v1140_v26 = vld [vmem:[#allocation5 + $0xf0] sm:$0xff]   ;;  %v1144_v30 = vld [vmem:[#allocation5 + $0xf8] sm:$0xff]   ;;  %v88_v35 = vpack.c.bf16 %v81_v34, %v81_v34  ;;  %v1146_v36 = vld [vmem:[#allocation5 + $0x140] sm:$0xff]  }
  0x54   :  { %979 = vmatprep.subr.bf16.mxu0 %v1126_v12  ;;  %v1141_v27 = vld [vmem:[#allocation5 + $0xb0] sm:$0xff]   ;;  %v1145_v33 = vld [vmem:[#allocation5 + $0xb8] sm:$0xff]   ;;  %v84_v37 = vld [vmem:[#allocation2 + $0x18] sm:$0xff] }
  0x55   :  { %1000 = vmatpush3.bf16.msra.mxu1 %v1125_v11  ;;  %v82_v31 = vld [vmem:[#allocation2 + $0x8] sm:$0xff]  ;;  %v91_v38 = vpack.c.bf16 %v84_v37, %v84_v37  ;;  %v1147_v39 = vld [vmem:[#allocation5 + $0x100] sm:$0xff]   ;;  %v83_v40 = vld [vmem:[#allocation2 + $0x10] sm:$0xff] }
  0x56   :  { %1001 = vmatprep.subr.bf16.mxu1 %v1128_v14  ;;  %v89_v32 = vpack.c.bf16 %v82_v31, %v82_v31  ;;  %v90_v41 = vpack.c.bf16 %v83_v40, %v83_v40  ;;  %v1148_v42 = vld [vmem:[#allocation5 + $0x148] sm:$0xff]   ;;  %v1150_v45 = vld [vmem:[#allocation5 + $0x150] sm:$0xff]   ;;  %v1152_v47 = vld [vmem:[#allocation5 + $0x158] sm:$0xff]  }
  0x57   :  { %980 = vmatpush3.bf16.msra.mxu0 %v1127_v13  ;;  %570 = vmatprep.mubr.bf16.mxu1 %v91_v38  ;;  %v1149_v43 = vld [vmem:[#allocation5 + $0x108] sm:$0xff]   ;;  %v1151_v46 = vld [vmem:[#allocation5 + $0x110] sm:$0xff]   ;;  %v1153_v48 = vld [vmem:[#allocation5 + $0x118] sm:$0xff]  }
  0x58   :  { %981 = vmatprep.subr.bf16.mxu0 %v1130_v16  ;;  %530 = vmatprep.mubr.bf16.mxu0 %v89_v32  ;;  %v1154_v49 = vld [vmem:[#allocation5 + $0x160] sm:$0xff]   ;;  %v1156_v51 = vld [vmem:[#allocation5 + $0x168] sm:$0xff]   ;;  %v86_v54 = vld [vmem:[#allocation2 + $0x28] sm:$0xff] }
  0x59   :  { %1002 = vmatpush3.bf16.msra.mxu1 %v1129_v15  ;;  %v1155_v50 = vld [vmem:[#allocation5 + $0x120] sm:$0xff]   ;;  %v1157_v52 = vld [vmem:[#allocation5 + $0x128] sm:$0xff]   ;;  %v1158_v55 = vld [vmem:[#allocation5 + $0x170] sm:$0xff]   ;;  %v93_v56 = vpack.c.bf16 %v86_v54, %v86_v54 }
  0x5a   :  { %1003 = vmatprep.subr.bf16.mxu1 %v1132_v18  ;;  %v1162_v53 = vld [vmem:[#allocation5 + $0x180] sm:$0xff]   ;;  %v87_v57 = vld [vmem:[#allocation2 + $0x30] sm:$0xff]  ;;  %v1159_v59 = vld [vmem:[#allocation5 + $0x130] sm:$0xff]  }
  0x5b   :  { %982 = vmatpush3.bf16.msra.mxu0 %v1131_v17  ;;  %v94_v58 = vpack.c.bf16 %v87_v57, %v87_v57  ;;  %v1160_v60 = vld [vmem:[#allocation5 + $0x178] sm:$0xff]   ;;  %v85_v62 = vld [vmem:[#allocation2 + $0x20] sm:$0xff]  ;;  %v1164_v1 = vld [vmem:[#allocation7 + $0x8] sm:$0xff]  }
  0x5c   :  { %983 = vmatprep.subr.bf16.mxu0 %v1134_v20  ;;  %v1161_v61 = vld [vmem:[#allocation5 + $0x138] sm:$0xff]   ;;  %v92_v63 = vpack.c.bf16 %v85_v62, %v85_v62  ;;  %v1163_v0 = vld [vmem:[#allocation7] sm:$0xff]   ;;  %v1166_v3 = vld [vmem:[#allocation7 + $0x18] sm:$0xff]  }
  0x5d   :  { %1004 = vmatpush3.bf16.msra.mxu1 %v1133_v19  ;;  %v1165_v2 = vld [vmem:[#allocation7 + $0x10] sm:$0xff]   ;;  %v1167_v4 = vld [vmem:[#allocation7 + $0x20] sm:$0xff]   ;;  %v1168_v5 = vld [vmem:[#allocation7 + $0x28] sm:$0xff]  }
  0x5e   :  { %1005 = vmatprep.subr.bf16.mxu1 %v1136_v22  ;;  %v1169_v6 = vld [vmem:[#allocation7 + $0x30] sm:$0xff]   ;;  %v1170_v7 = vld [vmem:[#allocation7 + $0x38] sm:$0xff]   ;;  %v1171_v8 = vld [vmem:[#allocation8] sm:$0xff]  }
  0x5f   :  { %984 = vmatpush3.bf16.msra.mxu0 %v1135_v21  ;;  %v1172_v9 = vld [vmem:[#allocation8 + $0x8] sm:$0xff]   ;;  %v1173_v10 = vld [vmem:[#allocation8 + $0x10] sm:$0xff]   ;;  %v1174_v11 = vld [vmem:[#allocation8 + $0x18] sm:$0xff]  }
  0x60   :  { %985 = vmatprep.subr.bf16.mxu0 %v1138_v24  ;;  %v1175_v12 = vld [vmem:[#allocation8 + $0x20] sm:$0xff]   ;;  %v1176_v13 = vld [vmem:[#allocation8 + $0x28] sm:$0xff]   ;;  %v1177_v40 = vld [vmem:[#allocation8 + $0x30] sm:$0xff]  }
  0x61   :  { %1006 = vmatpush3.bf16.msra.mxu1 %v1137_v23  ;;  %v904_v15 = vld [vmem:[%s1449_s2] ss:$0 sm:$0xff] }
  0x62   :  { %1007 = vmatprep.subr.bf16.mxu1 %v1140_v26 }
  0x63   :  { %986 = vmatpush3.bf16.msra.mxu0 %v1139_v25 }
  0x64   :  { %987 = vmatprep.subr.bf16.mxu0 %v1142_v28 }
  0x65   :  { %1008 = vmatpush3.bf16.msra.mxu1 %v1141_v27 }
  0x66   :  { %1009 = vmatprep.subr.bf16.mxu1 %v1144_v30 }
  0x67   :  { %988 = vmatpush3.bf16.msra.mxu0 %v1143_v29 }
  0x68   :  { %1017 = vmatprep.subr.bf16.mxu0 %v1146_v36 }
  0x69   :  { %1010 = vmatpush3.bf16.msra.mxu1 %v1145_v33 }
  0x6a   :  { %531 = vmatmul.mubr.bf16.vlgmr.msra.gmra.mrb[0].mxu0 %v88_v35  ;;  %1059 = vmatprep.subr.bf16.mxu1 %v1303_v44 }
  0x6b   :  { %1018 = vmatpush3.bf16.msra.mxu0 %v1147_v39  ;;  %610 = vmatprep.mubr.bf16.mxu0 %v93_v56 }
  0x6c   :  { %571 = vmatmul.mubr.bf16.vlgmr.msra.gmra.mrb[0].mxu1 %v90_v41  ;;  %1019 = vmatprep.subr.bf16.mxu0 %v1148_v42  ;;  %v1178_v41 = vld [vmem:[#allocation8 + $0x38] sm:$0xff]   ;;  %v955_v42 = vld [vmem:[%s1451_s4] ss:$0 sm:$0xff]  ;;  %s1267_s4 = scalar_lea.vmem %s894_s29, 128 }
  0x6d   :  { %1061 = vmatprep.mubr.msk.bf16.mxu1 %vm1304_vm0, %v1303_v44  ;;  %1060 = vmatpush3.bf16.msra.mxu1 %v1162_v53  ;;  %p1268_p4 = scmp.ne.s32.totalorder %s894_s29, %s1267_s4  ;;  %p1273_p6 = scmp.lt.s32.totalorder %s1267_s4, %s1267_s4 }
  0x6e   :  { %1065 = vmatprep.subr.bf16.mxu1 %v1303_v44 }
  0x6f   :  { %1020 = vmatpush3.bf16.msra.mxu0 %v1149_v43  ;;  %p1274_p7 = por %p1273_p6, %p1272_p5 }
  0x70   :  { %1021 = vmatprep.subr.bf16.mxu0 %v1150_v45 }
  0x71   :  { %p1275_p8 = pnand %p1274_p7, %p1268_p4 }
  0x73   :  { %1022 = vmatpush3.bf16.msra.mxu0 %v1151_v46 }
  0x74   :  { %1023 = vmatprep.subr.bf16.mxu0 %v1152_v47  ;;  %1062 = vmatmul.mubr.msk.bf16.vlgmr.msra.gmra.mrb[4].mxu1 %vm494_vm1, %v94_v58 }
  0x75   :  { %1081 = vmatprep.mubr.msk.bf16.mxu1 %vm1304_vm0, %v1303_v44  ;;  %1066 = vmatpush3.bf16.msra.mxu1 %v1163_v0 }
  0x76   :  { %1067 = vmatprep.subr.bf16.mxu1 %v1303_v44 }
  0x77   :  { %1024 = vmatpush3.bf16.msra.mxu0 %v1153_v48 }
  0x78   :  { %1025 = vmatprep.subr.bf16.mxu0 %v1154_v49 }
  0x79   :  { %1068 = vmatpush3.bf16.msra.mxu1 %v1164_v1 }
  0x7a   :  { %1069 = vmatprep.subr.bf16.mxu1 %v1303_v44 }
  0x7b   :  { %1026 = vmatpush3.bf16.msra.mxu0 %v1155_v50 }
  0x7c   :  { %1027 = vmatprep.subr.bf16.mxu0 %v1156_v51 }
  0x7d   :  { %1070 = vmatpush3.bf16.msra.mxu1 %v1165_v2 }
  0x7e   :  { %1071 = vmatprep.subr.bf16.mxu1 %v1303_v44 }
  0x7f   :  { %1028 = vmatpush3.bf16.msra.mxu0 %v1157_v52  ;;  %v964_v52 = vld [vmem:[%s1453_s6] ss:$0 sm:$0xff] }
  0x80   :  { %1029 = vmatprep.subr.bf16.mxu0 %v1158_v55 }
  0x81   :  { %1072 = vmatpush3.bf16.msra.mxu1 %v1166_v3 }
  0x82   :  { %1073 = vmatprep.subr.bf16.mxu1 %v1303_v44 }
  0x83   :  { %1030 = vmatpush3.bf16.msra.mxu0 %v1159_v59 }
  0x84   :  { %1031 = vmatprep.subr.bf16.mxu0 %v1160_v60 }
  0x85   :  { %1074 = vmatpush3.bf16.msra.mxu1 %v1167_v4 }
  0x86   :  { %1075 = vmatprep.subr.bf16.mxu1 %v1303_v44 }
  0x87   :  { %1032 = vmatpush3.bf16.msra.mxu0 %v1161_v61 }
  0x88   :  { %1085 = vmatprep.subr.bf16.mxu0 %v1303_v44 }
  0x89   :  { %1076 = vmatpush3.bf16.msra.mxu1 %v1168_v5 }
  0x8a   :  { %611 = vmatmul.mubr.bf16.vlgmr.msra.gmra.mrb[4].mxu0 %v92_v63  ;;  %1077 = vmatprep.subr.bf16.mxu1 %v1303_v44 }
  0x8b   :  { %1101 = vmatprep.mubr.msk.bf16.mxu0 %vm1304_vm0, %v1303_v44  ;;  %1086 = vmatpush3.bf16.msra.mxu0 %v1171_v8 }
  0x8c   :  { %1087 = vmatprep.subr.bf16.mxu0 %v1303_v44 }
  0x8d   :  { %1078 = vmatpush3.bf16.msra.mxu1 %v1169_v6 }
  0x8e   :  { %1079 = vmatprep.subr.bf16.mxu1 %v1303_v44 }
  0x8f   :  { %1088 = vmatpush3.bf16.msra.mxu0 %v1172_v9 }
  0x90   :  { %1089 = vmatprep.subr.bf16.mxu0 %v1303_v44 }
  0x91   :  { %1080 = vmatpush3.bf16.msra.mxu1 %v1170_v7 }
  0x93   :  { %1090 = vmatpush3.bf16.msra.mxu0 %v1173_v10 }
  0x94   :  { %1091 = vmatprep.subr.bf16.mxu0 %v1303_v44 }
  0x97   :  { %1092 = vmatpush3.bf16.msra.mxu0 %v1174_v11 }
  0x98   :  { %1093 = vmatprep.subr.bf16.mxu0 %v1303_v44 }
  0x9b   :  { %1094 = vmatpush3.bf16.msra.mxu0 %v1175_v12 }
  0x9c   :  { %1095 = vmatprep.subr.bf16.mxu0 %v1303_v44 }
  0x9f   :  { %1096 = vmatpush3.bf16.msra.mxu0 %v1176_v13 }
  0xa0   :  { %1097 = vmatprep.subr.bf16.mxu0 %v1303_v44 }
  0xa3   :  { %1098 = vmatpush3.bf16.msra.mxu0 %v1177_v40 }
  0xa4   :  { %1099 = vmatprep.subr.bf16.mxu0 %v1303_v44 }
  0xa7   :  { %1100 = vmatpush3.bf16.msra.mxu0 %v1178_v41 }
 0x13d   :  { %v989_v14 = vpop.f32.mrb[0].mxu0 }
 0x13e   :  { %v990_v16 = vpop.f32.mrb[1].mxu0 }
 0x13f   :  { %v991_v17 = vadd.f32 %v990_v16, %v989_v14  ;;  %v992_v18 = vpop.f32.mrb[2].mxu0  ;;  %v1011_v19 = vpop.f32.mrb[0].mxu1 }
 0x140   :  { %v993_v20 = vpop.f32.mrb[3].mxu0  ;;  %v1012_v22 = vpop.f32.mrb[1].mxu1 }
 0x141   :  { %v533_v21 = vadd.f32 %v991_v17, %v904_v15  ;;  %v1013_v23 = vadd.f32 %v1012_v22, %v1011_v19  ;;  %v1014_v24 = vpop.f32.mrb[2].mxu1 }
 0x142   :  { %v1015_v25 = vpop.f32.mrb[3].mxu1 }
 0x143   :  { %v573_v26 = vadd.f32 %v1013_v23, %v533_v21 }
 0x147   :  { %v652_v27 = vpop.f32.mrb[4].mxu1 }
 0x148   :  { %v1063_v28 = vpop.f32.mrb[5].mxu1 }
 0x149   :  { %v655_v29 = vpop.f32.mrb[6].mxu1 }
 0x14a   :  { %v1064_v30 = vpop.f32.mrb[7].mxu1 }
 0x15d   :  { %v1033_v31 = vpop.f32.mrb[4].mxu0 }
 0x15e   :  { %v1034_v32 = vpop.f32.mrb[5].mxu0 }
 0x15f   :  { %v1035_v33 = vadd.f32 %v1034_v32, %v1033_v31  ;;  %v1036_v34 = vpop.f32.mrb[6].mxu0 }
 0x160   :  { %v1037_v35 = vpop.f32.mrb[7].mxu0 }
 0x161   :  { %v613_v36 = vadd.f32 %v1035_v33, %v573_v26 }
 0x163   :  { %v653_v37 = vadd.f32 %v652_v27, %v613_v36 }
 0x165   :  { %v658_v38 = vmax.f32 %v653_v37, 0.0 }
 0x167   :  { %v659_v39 = vpack.c.bf16 %v658_v38, %v658_v38 }
 0x169   :  { %1082 = vmatmul.mubr.bf16.vlgmr.msra.gmra.mrb[8].mxu1 %v659_v39 }
 0x23c   :  { %v765_v43 = vpop.f32.mrb[8].mxu1 }
 0x23d   :  { %v766_v45 = vadd.f32 %v955_v42, %v765_v43  ;;  %v1083_v46 = vpop.f32.mrb[9].mxu1 }
 0x23e   :  { %v768_v47 = vpop.f32.mrb[10].mxu1 }
 0x23f   :  { %v771_v48 = vmax.f32 %v766_v45, 0.0  ;;  %v1084_v49 = vpop.f32.mrb[11].mxu1 }
 0x241   :  { %v772_v50 = vadd.f32 %v771_v48, %v658_v38 }
 0x243   :  { %v773_v51 = vpack.c.bf16 %v772_v50, %v772_v50 }
 0x245   :  { %1102 = vmatmul.mubr.bf16.vlgmr.msra.gmra.mrb[8].mxu0 %v773_v51 }
 0x318   :  { %v879_v44 = vpop.f32.mrb[8].mxu0 }
 0x319   :  { %v880_v53 = vadd.f32 %v964_v52, %v879_v44  ;;  %v1103_v54 = vpop.f32.mrb[9].mxu0 }
 0x31a   :  { %v882_v55 = vpop.f32.mrb[10].mxu0 }
 0x31b   :  { %v1104_v56 = vpop.f32.mrb[11].mxu0  ;;  %886 = vst.msk [vmem:[#allocation10] sm:$0xff] %vm885_vm2, %v880_v53 }
 0x31c   :  { %1278 = shalt.err (!%p1275_p8)
}
 0x31d   :  { %s1279_s6 = scalar_lea.hbm %s1454_s7, 128 }
 0x31e   :  { %p1280_p9 = scmp.ne.s32.totalorder %s1454_s7, %s1279_s6  ;;  %p1283_p10 = scmp.lt.u32.totalorder %s1279_s6, %s1454_s7 }
 0x320   :  { %p1285_p11 = pnand %p1283_p10, %p1280_p9 }
 0x322   :  { %1288 = shalt.err (!%p1285_p11)
}
 0x323   :  { %896 = dma.vmem_to_hbm [thread:$0]  %s894_s29, 128, %s1454_s7, [#allocation4]  }
 0x324   :  { %1295 = dma.done.wait [#allocation4], 128  }
 0x325   :  { %1296 = vsyncadd [#allocation4], 4294967168 }
 0x326   :  { %900 = vsyncpa [#allocation3], 1 }
 0x327   :  { %901 = vsyncpa [#allocation6], 1 }
 0x328   :  { %902 = vsyncpa [#allocation9], 1 }
 0x329   :  { %903 = vsyncpa [#allocation4], 1 }

</bundles_post_ra>
